<compile_context>
chip_gen: v5e
topology: v5e:2x2
jax: 0.10.0
libtpu: 0.0.40
codegen_flags: <defaults>
</compile_context>

<pallas_src>
import functools

import jax
import jax.numpy as jnp
import numpy as np
from jax.experimental import pallas as pl
from jax.experimental.pallas import tpu as pltpu

CHANNEL_CNN = 128
CHANNEL_FC = 128
CONV_K = 4
SEQ_LEN = 8                                   # L; conv output length = 5
CONV_OUT_LEN = SEQ_LEN - CONV_K + 1           # 5
BRANCH_W = CHANNEL_CNN * CONV_OUT_LEN         # 640
INCOMING = 2 * BRANCH_W + 2 * CHANNEL_FC      # 1536
RAW_FEATS = 2 * SEQ_LEN + 2                   # 18 raw features per row
BIAS_COL = RAW_FEATS                          # column 18 carries the constant 1.0
K_PAD = 32                                    # raw feats + bias col, padded to 32


# --------------------------------------------------------------------- chip probe
def _device_kind():
    try:
        return jax.devices()[0].device_kind.lower()
    except Exception:  # pragma: no cover
        return ""


_KIND = _device_kind()
# v5e and older have no bf16 VALU -> keep the wide ReLU in f32 there.
_IS_PRE_V6 = any(g in _KIND for g in ("v2", "v3", "v4", "v5"))


# --------------------------------------------------------------------------- kernel
def _critic_kernel(x_ref, w_in_ref, w1_ref, b1_ref, ow_ref, ob_ref, out_ref, *,
                   relu_bf16):
    # x_ref   : (Bt, 32)      bf16   [tp(8), dt(8), s0, s1, 1.0(bias), 0-pad]
    # w_in_ref: (32, 1536)    bf16   fused conv-Toeplitz + scalar weights + bias row
    # w1_ref  : (1536, 128)   bf16   permuted fc1 weight (transposed)
    # b1_ref  : (1, 128)      f32
    # ow_ref  : (1, 128)      f32    fc3 weight
    # ob_ref  : (1, 1)        f32    fc3 bias
    # out_ref : (Bt, 1)       f32
    x = x_ref[...]

    # relu(conv1 | conv2 | fc_3 | fc_2) concat, biases folded into the matmul.
    concat = jnp.dot(x, w_in_ref[...], preferred_element_type=jnp.float32)
    if relu_bf16:
        # v6e/v7x: bf16 VALU -> ReLU touches half the vregs, cast fused into pop.
        concat = jnp.maximum(concat.astype(jnp.bfloat16), 0)
    else:
        # v5e: no bf16 VALU -> ReLU in f32, then cast for the fc1 matmul.
        concat = jnp.maximum(concat, 0.0).astype(jnp.bfloat16)

    # relu(fc1(concat)) : single K=1536 matmul.
    h = jnp.dot(concat, w1_ref[...], preferred_element_type=jnp.float32)
    h = jnp.maximum(h + b1_ref[...], 0.0)                        # (Bt, 128) f32

    # fc3: N=1 -> VPU multiply + lane reduce instead of a degenerate MXU dot.
    out_ref[...] = jnp.sum(h * ow_ref[...], axis=-1, keepdims=True) + ob_ref[...]


# --------------------------------------------------------------- weight prep (one-time)
def _conv_toeplitz(conv_w):
    """(128, 1, 4) conv weight -> (8, 640) Toeplitz matrix, output col = t*128 + c."""
    w = conv_w[:, 0, :]                                          # (128, 4)
    toe = jnp.zeros((SEQ_LEN, CONV_OUT_LEN, CHANNEL_CNN), jnp.float32)
    for t in range(CONV_OUT_LEN):
        toe = toe.at[t:t + CONV_K, t, :].set(w.T)                # (4, 128) slab
    return toe.reshape(SEQ_LEN, CONV_OUT_LEN * CHANNEL_CNN)


def prepare_params(params):
    """One-time re-layout of torch-shaped params into kernel-ready fused weights."""
    toe1 = _conv_toeplitz(params["conv1_w"])                     # (8, 640)
    toe2 = _conv_toeplitz(params["conv2_w"])                     # (8, 640)

    # Concatenated bias for all four branches, in the kernel's t-major layout.
    b_in = jnp.concatenate([
        jnp.tile(params["conv1_b"], CONV_OUT_LEN),
        jnp.tile(params["conv2_b"], CONV_OUT_LEN),
        params["fc_3_b"], params["fc_2_b"],
    ])                                                           # (1536,)

    w_in = jnp.zeros((K_PAD, INCOMING), jnp.float32)
    w_in = w_in.at[0:SEQ_LEN, 0:BRANCH_W].set(toe1)
    w_in = w_in.at[SEQ_LEN:2 * SEQ_LEN, BRANCH_W:2 * BRANCH_W].set(toe2)
    w_in = w_in.at[16, 2 * BRANCH_W:2 * BRANCH_W + CHANNEL_FC].set(params["fc_3_w"][:, 0])
    w_in = w_in.at[17, 2 * BRANCH_W + CHANNEL_FC:INCOMING].set(params["fc_2_w"][:, 0])
    # Bias row: multiplied by the constant 1.0 in x column 18 (fold the bias add
    # into the MXU pass; removes a full VPU pass over the (Bt,1536) intermediate).
    w_in = w_in.at[BIAS_COL, :].set(b_in)

    # Column permutation: kernel concat col (branch, t, c) = branch*640 + t*128 + c
    # maps to PyTorch flatten col branch*640 + c*5 + t.
    t_idx = np.arange(CONV_OUT_LEN)
    c_idx = np.arange(CHANNEL_CNN)
    branch_perm = (c_idx[None, :] * CONV_OUT_LEN + t_idx[:, None]).reshape(-1)
    perm = np.concatenate([branch_perm, BRANCH_W + branch_perm,
                           np.arange(2 * BRANCH_W, INCOMING)])
    w1 = params["fc1_w"][:, perm].T                              # (1536, 128)

    return {
        "w_in": w_in.astype(jnp.bfloat16),
        "w1": w1.astype(jnp.bfloat16),
        "b1": params["fc1_b"][None, :].astype(jnp.float32),
        "ow": params["fc3_w"].astype(jnp.float32),               # (1, 128)
        "ob": params["fc3_b"][None, :].astype(jnp.float32),      # (1, 1)
    }


# -------------------------------------------------------------------------- wrapper
def _batch_tile(batch):
    # Large tiles amortize the ~0.35us per-grid-step overhead; v5e capped at 512
    # (smaller scoped-VMEM default), v6e/v7x go to 1024.
    cap = 512 if _IS_PRE_V6 else 1024
    if batch >= 2 * cap:
        return cap
    if batch >= 32:
        # Split into >=2 grid steps so both v7x TensorCores get work
        # ("parallel" only shards across cores when the grid has >1 step).
        half = (batch + 1) // 2
        return min(cap, ((half + 15) // 16) * 16)
    return max(16, ((batch + 15) // 16) * 16)


@functools.partial(jax.jit, static_argnames=("action_space",))
def critic_forward(inputs, prepared, *, action_space):
    """inputs: (B, C>=5, 8) float32, NCL layout (torch convention)."""
    del action_space  # sizes_batch slice is never consumed in the torch forward
    inputs = inputs.astype(jnp.float32)
    batch = inputs.shape[0]

    # Raw per-row features: [throughputs(8), download_times(8), s0, s1, 1.0],
    # then zero-pad to 32 columns. Column 18 == 1.0 drives the folded bias row.
    feats = jnp.concatenate(
        [inputs[:, 2, :], inputs[:, 3, :], inputs[:, 0, -1:], inputs[:, 1, -1:],
         jnp.ones((batch, 1), jnp.float32)],
        axis=1,
    )                                                            # (B, 19)

    b_tile = _batch_tile(batch)
    b_pad = ((batch + b_tile - 1) // b_tile) * b_tile
    x = jnp.pad(feats, ((0, b_pad - batch), (0, K_PAD - feats.shape[1])))
    x = x.astype(jnp.bfloat16)                                   # (b_pad, 32)

    cost = pl.CostEstimate(
        flops=2 * b_pad * (K_PAD * INCOMING + INCOMING * CHANNEL_FC + CHANNEL_FC),
        transcendentals=0,
        bytes_accessed=(b_pad * K_PAD * 2                 # x (bf16)
                        + K_PAD * INCOMING * 2            # w_in (bf16)
                        + INCOMING * CHANNEL_FC * 2       # w1 (bf16)
                        + 2 * CHANNEL_FC * 4 + 4          # b1, ow, ob (f32)
                        + b_pad * 4),                     # output (f32)
    )

    const = lambda i: (0, 0)   # weights resident across the batch grid
    out = pl.pallas_call(
        functools.partial(_critic_kernel, relu_bf16=not _IS_PRE_V6),
        out_shape=jax.ShapeDtypeStruct((b_pad, 1), jnp.float32),
        grid=(b_pad // b_tile,),
        in_specs=[
            pl.BlockSpec((b_tile, K_PAD), lambda i: (i, 0)),
            pl.BlockSpec((K_PAD, INCOMING), const),
            pl.BlockSpec((INCOMING, CHANNEL_FC), const),
            pl.BlockSpec((1, CHANNEL_FC), const),
            pl.BlockSpec((1, CHANNEL_FC), const),
            pl.BlockSpec((1, 1), const),
        ],
        out_specs=pl.BlockSpec((b_tile, 1), lambda i: (i, 0)),
        compiler_params=pltpu.CompilerParams(
            dimension_semantics=("parallel",),
            vmem_limit_bytes=32 << 20,
        ),
        cost_estimate=cost,
    )(x, prepared["w_in"], prepared["w1"], prepared["b1"],
      prepared["ow"], prepared["ob"])
    return out[:batch]


# --------------------------------------------------------------------------- params
def init_params(key):
    """Deterministic synthetic parameters with the shapes Critic.__init__ implies."""
    ks = jax.random.split(key, 12)

    def unif(k, shape, fan_in):
        bound = 1.0 / np.sqrt(fan_in)
        return jax.random.uniform(k, shape, jnp.float32, -bound, bound)

    return {
        "conv1_w": unif(ks[0], (CHANNEL_CNN, 1, CONV_K), CONV_K),
        "conv1_b": unif(ks[1], (CHANNEL_CNN,), CONV_K),
        "conv2_w": unif(ks[2], (CHANNEL_CNN, 1, CONV_K), CONV_K),
        "conv2_b": unif(ks[3], (CHANNEL_CNN,), CONV_K),
        "fc_2_w": unif(ks[4], (CHANNEL_FC, 1), 1),
        "fc_2_b": unif(ks[5], (CHANNEL_FC,), 1),
        "fc_3_w": unif(ks[6], (CHANNEL_FC, 1), 1),
        "fc_3_b": unif(ks[7], (CHANNEL_FC,), 1),
        "fc1_w": unif(ks[8], (CHANNEL_FC, INCOMING), INCOMING),
        "fc1_b": unif(ks[9], (CHANNEL_FC,), INCOMING),
        "fc3_w": unif(ks[10], (1, CHANNEL_FC), CHANNEL_FC),
        "fc3_b": unif(ks[11], (1,), CHANNEL_FC),
    }


# ------------------------------------------------------------------------ reference
def _extract_patches(x):  # x: (B, L) -> (B, 5, 4)
    return jnp.stack([x[:, t: t + CONV_K] for t in range(CONV_OUT_LEN)], axis=1)


def critic_reference(inputs, params, *, action_space):
    """Pure-JAX (f32) transliteration of the torch forward, for correctness check."""
    del action_space
    ptp = _extract_patches(inputs[:, 2, :])
    pdt = _extract_patches(inputs[:, 3, :])
    x1 = jax.nn.relu(
        jnp.einsum("btk,ck->bct", ptp, params["conv1_w"][:, 0, :])
        + params["conv1_b"][None, :, None]
    )                                                            # (B, 128, 5)
    x2 = jax.nn.relu(
        jnp.einsum("btk,ck->bct", pdt, params["conv2_w"][:, 0, :])
        + params["conv2_b"][None, :, None]
    )
    s0 = inputs[:, 0, -1][:, None]
    s1 = inputs[:, 1, -1][:, None]
    x4 = jax.nn.relu(s0 @ params["fc_3_w"].T + params["fc_3_b"])
    x5 = jax.nn.relu(s1 @ params["fc_2_w"].T + params["fc_2_b"])
    b = inputs.shape[0]
    x = jnp.concatenate([x1.reshape(b, -1), x2.reshape(b, -1), x4, x5], axis=1)
    h = jax.nn.relu(x @ params["fc1_w"].T + params["fc1_b"])
    return h @ params["fc3_w"].T + params["fc3_b"]


# ----------------------------------------------------------------------------- main
if __name__ == "__main__":
    key = jax.random.PRNGKey(0)
    k_in, k_in2, k_par = jax.random.split(key, 3)

    action_space = 6
    channels, seq = 6, SEQ_LEN                           # inputs (B, C, L) NCL layout
    params = init_params(k_par)
    prepared = prepare_params(params)                    # one-time weight re-layout

    # Small batch (single grid step) and a medium batch that exercises padding
    # plus the >=2-grid-step split used for megacore sharding.
    for kk, batch in ((k_in, 2), (k_in2, 100)):
        inputs = jax.random.normal(kk, (batch, channels, seq), jnp.float32)
        out = critic_forward(inputs, prepared, action_space=action_space)
        out = jax.block_until_ready(out)
        ref = critic_reference(inputs, params, action_space=action_space)
        # bf16 matmul operands (f32 accumulation) -> loosened tolerance vs f32 ref.
        np.testing.assert_allclose(np.asarray(out), np.asarray(ref),
                                   rtol=2e-2, atol=2e-2)

    print("KERNEL_OK")
</pallas_src>

<mosaic_0001>
module attributes {stable_mosaic.version = 11 : i64} {
  func.func @_critic_kernel(%arg0: i32, %arg1: memref<16x32xbf16, #tpu.memory_space<vmem>>, %arg2: memref<32x1536xbf16, #tpu.memory_space<vmem>>, %arg3: memref<1536x128xbf16, #tpu.memory_space<vmem>>, %arg4: memref<1x128xf32, #tpu.memory_space<vmem>>, %arg5: memref<1x128xf32, #tpu.memory_space<vmem>>, %arg6: memref<1x1xf32, #tpu.memory_space<vmem>>, %arg7: memref<16x1xf32, #tpu.memory_space<vmem>>) attributes {dimension_semantics = [#tpu.dimension_semantics<parallel>], iteration_bounds = array<i64: 1>, scalar_prefetch = 0 : i64, scratch_operands = 0 : i64, tpu.core_type = #tpu.core_type<tc>, window_params = [{transform_indices = @transform_0, window_bounds = array<i64: 16, 32>}, {pipeline_mode = #tpu.pipeline_mode<synchronous>, transform_indices = @transform_1, window_bounds = array<i64: 32, 1536>}, {pipeline_mode = #tpu.pipeline_mode<synchronous>, transform_indices = @transform_2, window_bounds = array<i64: 1536, 128>}, {pipeline_mode = #tpu.pipeline_mode<synchronous>, transform_indices = @transform_3, window_bounds = array<i64: 1, 128>}, {pipeline_mode = #tpu.pipeline_mode<synchronous>, transform_indices = @transform_4, window_bounds = array<i64: 1, 128>}, {pipeline_mode = #tpu.pipeline_mode<synchronous>, transform_indices = @transform_5, window_bounds = array<i64: 1, 1>}, {transform_indices = @transform_6, window_bounds = array<i64: 16, 1>}]} {
    %c0 = arith.constant 0 : index
    %c0_0 = arith.constant 0 : index
    %0 = vector.load %arg1[%c0, %c0_0] : memref<16x32xbf16, #tpu.memory_space<vmem>>, vector<16x32xbf16>
    %c0_1 = arith.constant 0 : index
    %c0_2 = arith.constant 0 : index
    %1 = vector.load %arg2[%c0_1, %c0_2] : memref<32x1536xbf16, #tpu.memory_space<vmem>>, vector<32x1536xbf16>
    %cst = arith.constant dense<0.000000e+00> : vector<16x1536xf32>
    %2 = tpu.matmul %0, %1, %cst {dimension_numbers = #tpu.dot_dimension_numbers<[1], [0], [0], [1], [0, 0, 1, 1], [], []>} : vector<16x32xbf16>, vector<32x1536xbf16>, vector<16x1536xf32> -> vector<16x1536xf32>
    %3 = arith.truncf %2 : vector<16x1536xf32> to vector<16x1536xbf16>
    %cst_3 = arith.constant 0.000000e+00 : bf16
    %4 = vector.broadcast %cst_3 : bf16 to vector<16x1536xbf16>
    %5 = arith.maximumf %3, %4 : vector<16x1536xbf16>
    %c0_4 = arith.constant 0 : index
    %c0_5 = arith.constant 0 : index
    %6 = vector.load %arg3[%c0_4, %c0_5] : memref<1536x128xbf16, #tpu.memory_space<vmem>>, vector<1536x128xbf16>
    %cst_6 = arith.constant dense<0.000000e+00> : vector<16x128xf32>
    %7 = tpu.matmul %5, %6, %cst_6 {dimension_numbers = #tpu.dot_dimension_numbers<[1], [0], [0], [1], [0, 0, 1, 1], [], []>} : vector<16x1536xbf16>, vector<1536x128xbf16>, vector<16x128xf32> -> vector<16x128xf32>
    %c0_7 = arith.constant 0 : index
    %c0_8 = arith.constant 0 : index
    %8 = vector.load %arg4[%c0_7, %c0_8] : memref<1x128xf32, #tpu.memory_space<vmem>>, vector<1x128xf32>
    %9 = vector.broadcast %8 : vector<1x128xf32> to vector<16x128xf32>
    %10 = arith.addf %7, %9 : vector<16x128xf32>
    %cst_9 = arith.constant 0.000000e+00 : f32
    %11 = vector.broadcast %cst_9 : f32 to vector<16x128xf32>
    %12 = arith.maximumf %10, %11 : vector<16x128xf32>
    %c0_10 = arith.constant 0 : index
    %c0_11 = arith.constant 0 : index
    %13 = vector.load %arg5[%c0_10, %c0_11] : memref<1x128xf32, #tpu.memory_space<vmem>>, vector<1x128xf32>
    %14 = vector.broadcast %13 : vector<1x128xf32> to vector<16x128xf32>
    %15 = arith.mulf %12, %14 : vector<16x128xf32>
    %cst_12 = arith.constant dense<0.000000e+00> : vector<16xf32>
    %16 = vector.multi_reduction <add>, %15, %cst_12 [1] : vector<16x128xf32> to vector<16xf32>
    %17 = vector.shape_cast %16 : vector<16xf32> to vector<16x1xf32>
    %c0_13 = arith.constant 0 : index
    %c0_14 = arith.constant 0 : index
    %18 = vector.load %arg6[%c0_13, %c0_14] : memref<1x1xf32, #tpu.memory_space<vmem>>, vector<1x1xf32>
    %19 = vector.broadcast %18 : vector<1x1xf32> to vector<16x1xf32>
    %20 = arith.addf %17, %19 : vector<16x1xf32>
    %c0_15 = arith.constant 0 : index
    %c0_16 = arith.constant 0 : index
    %21 = vector.load %arg7[%c0_15, %c0_16] : memref<16x1xf32, #tpu.memory_space<vmem>>, vector<16x1xf32>
    tpu.vector_store %arg7[%c0_15, %c0_16], %20 {strides = array<i32>} : memref<16x1xf32, #tpu.memory_space<vmem>>, vector<16x1xf32>,
    return
  }
  func.func @transform_0(%arg0: i32) -> (i32, i32) {
    %c0_i32 = arith.constant 0 : i32
    %c0_i32_0 = arith.constant 0 : i32
    return %arg0, %c0_i32 : i32, i32
  }
  func.func @transform_1(%arg0: i32) -> (i32, i32) {
    %c0_i32 = arith.constant 0 : i32
    %c0_i32_0 = arith.constant 0 : i32
    %c0_i32_1 = arith.constant 0 : i32
    return %c0_i32, %c0_i32_0 : i32, i32
  }
  func.func @transform_2(%arg0: i32) -> (i32, i32) {
    %c0_i32 = arith.constant 0 : i32
    %c0_i32_0 = arith.constant 0 : i32
    %c0_i32_1 = arith.constant 0 : i32
    return %c0_i32, %c0_i32_0 : i32, i32
  }
  func.func @transform_3(%arg0: i32) -> (i32, i32) {
    %c0_i32 = arith.constant 0 : i32
    %c0_i32_0 = arith.constant 0 : i32
    %c0_i32_1 = arith.constant 0 : i32
    return %c0_i32, %c0_i32_0 : i32, i32
  }
  func.func @transform_4(%arg0: i32) -> (i32, i32) {
    %c0_i32 = arith.constant 0 : i32
    %c0_i32_0 = arith.constant 0 : i32
    %c0_i32_1 = arith.constant 0 : i32
    return %c0_i32, %c0_i32_0 : i32, i32
  }
  func.func @transform_5(%arg0: i32) -> (i32, i32) {
    %c0_i32 = arith.constant 0 : i32
    %c0_i32_0 = arith.constant 0 : i32
    %c0_i32_1 = arith.constant 0 : i32
    return %c0_i32, %c0_i32_0 : i32, i32
  }
  func.func @transform_6(%arg0: i32) -> (i32, i32) {
    %c0_i32 = arith.constant 0 : i32
    %c0_i32_0 = arith.constant 0 : i32
    return %arg0, %c0_i32 : i32, i32
  }
}

</mosaic_0001>

<bundles_post_ra>
// kernel: critic_forward.1
= control target key start
LH: loop header
LB: loop body
LE: loop exit
PB: predicated region body
PF: predicated region fallthrough
CT: control target
= control target key end

     0   :  { %s2189_s0 = inlined_call_operand.vmem [shape: bf16[16,32], index: 0, kind: input, shape index: {}]   ;;  %s2190_s1 = inlined_call_operand.hbm [shape: bf16[32,1536], index: 1, kind: input, shape index: {}]   ;;  %s2191_s2 = inlined_call_operand.hbm [shape: bf16[1536,128], index: 2, kind: input, shape index: {}]   ;;  %s2192_s3 = inlined_call_operand.vmem [shape: f32[1,128], index: 3, kind: input, shape index: {}]   ;;  %s2193_s4 = inlined_call_operand.vmem [shape: f32[1,128], index: 4, kind: input, shape index: {}]   ;;  %s2194_s5 = inlined_call_operand.<no memory space> [shape: f32[1,1], index: 5, kind: input, shape index: {}]   ;;  %s2195_s6 = inlined_call_operand.vmem [shape: f32[16,1], index: 6, kind: output, shape index: {}]  }
   0x1   :  { %v11_v0 = vstv %s2194_s5 }
   0x2   :  { %12 = vst [vmem:[#allocation2] sm:$0x1] %v11_v0 }
   0x3   :  { %13 = vsyncpa [#allocation4], 0  ;;  %s21_s25 = sshll.u32 %s2190_s1, 4  ;;  %s22_s25 = int_to_ptr.hbm [resolvable:$true] %s21_s25 }
   0x4   :  { %14 = vsyncpa [#allocation6], 0  ;;  %s2098_s26 = smov [#allocation3]   ;;  %s34_s30 = sshll.u32 %s2191_s2, 4  ;;  %s35_s30 = int_to_ptr.hbm [resolvable:$true] %s34_s30 }
   0x5   :  { %s23_s27 = sshll.u32 %s2098_s26, 4  ;;  %s2099_s7 = smov 768   ;;  %s24_s27 = int_to_ptr.vmem [resolvable:$true] %s23_s27 }
   0x6   :  { %s2100_s8 = smov 48   ;;  %s2101_s5 = smov [#allocation5]  }
   0x7   :  { %29 = dma.hbm_to_vmem [thread:$0]  %s22_s25, 3072, %s24_s27, [#allocation4], %s2099_s7, %s2099_s7, %s2100_s8  }
   0x8   :  { %s36_s9 = sshll.u32 %s2101_s5, 4  ;;  %s2102_s10 = smov 64   ;;  %s37_s9 = int_to_ptr.vmem [resolvable:$true] %s36_s9 }
   0x9   :  { %s2103_s11 = smov 4  }
   0xa   :  { %42 = dma.hbm_to_vmem [thread:$0]  %s35_s30, 12288, %s37_s9, [#allocation6], %s2102_s10, %s2102_s10, %s2103_s11  }
   0xb   :  { %2094 = dma.done.wait [#allocation4], 3072  }
   0xc   :  { %2095 = vsyncadd [#allocation4], 4294964224 }
   0xd   :  { %2096 = dma.done.wait [#allocation6], 12288  }
   0xe   :  { %2097 = vsyncadd [#allocation6], 4294955008  ;;  %v1474_v1 = vld [vmem:[#allocation3 + $0x60] sm:$0xf]  ;;  %v1935_v2 = vld [vmem:[#allocation3 + $0x8c] sm:$0xf0] }
   0xf   :  { %v1929_v3 = vld [vmem:[#allocation3 + $0x64] sm:$0xf]  ;;  %v1475_v4 = vor.u32 %v1935_v2, %v1474_v1  ;;  %v1476_v5 = vld [vmem:[#allocation3 + $0x90] sm:$0xf0]  ;;  %v1482_v6 = vld [vmem:[#allocation3 + $0x68] sm:$0xf] }
  0x10   :  { %v1936_v7 = vld [vmem:[#allocation3 + $0x94] sm:$0xf0]  ;;  %v1479_v8 = vor.u32 %v1929_v3, %v1476_v5  ;;  %v1930_v10 = vld [vmem:[#allocation3 + $0x6c] sm:$0xf]  ;;  %v1484_v11 = vld [vmem:[#allocation3 + $0x98] sm:$0xf0] }
  0x11   :  { %v1483_v9 = vor.u32 %v1936_v7, %v1482_v6  ;;  %v1426_v12 = vld [vmem:[#allocation3] sm:$0xf]  ;;  %219 = vmatpush.bf16.msra.mxu0 %v1475_v4  ;;  %v1487_v13 = vor.u32 %v1930_v10, %v1484_v11  ;;  %v1923_v14 = vld [vmem:[#allocation3 + $0x2c] sm:$0xf0]  ;;  %v1917_v15 = vld [vmem:[#allocation3 + $0x4] sm:$0xf] }
  0x12   :  { %v1428_v16 = vld [vmem:[#allocation3 + $0x30] sm:$0xf0]  ;;  %233 = vmatpush.bf16.msra.mxu1 %v1479_v8  ;;  %v1427_v17 = vor.u32 %v1923_v14, %v1426_v12  ;;  %v1434_v19 = vld [vmem:[#allocation3 + $0x8] sm:$0xf]  ;;  %v1924_v20 = vld [vmem:[#allocation3 + $0x34] sm:$0xf0] }
  0x13   :  { %247 = vmatpush.bf16.msra.mxu2 %v1483_v9  ;;  %v1431_v18 = vor.u32 %v1917_v15, %v1428_v16  ;;  %v1918_v21 = vld [vmem:[#allocation3 + $0xc] sm:$0xf]  ;;  %261 = vmatpush.bf16.msra.mxu3 %v1487_v13  ;;  %v1435_v22 = vor.u32 %v1924_v20, %v1434_v19  ;;  %v1436_v23 = vld [vmem:[#allocation3 + $0x38] sm:$0xf0]  ;;  %vm209_vm0 = vcmask 261120   ;;  %v1947_v14 = vld [vmem:[#allocation5 + $0x30] sm:$0xff] }
  0x14   :  { %v2151_v24 = vld [vmem:[%s2189_s0] sm:$0xff]  ;;  %v1498_v25 = vld [vmem:[#allocation3 + $0x78] sm:$0xf]  ;;  %v1439_v26 = vor.u32 %v1918_v21, %v1436_v23  ;;  %v1938_v27 = vld [vmem:[#allocation3 + $0xa4] sm:$0xf0]  ;;  %vm1411_vm1 = vcmask 7168  }
  0x15   :  { %v1932_v28 = vld [vmem:[#allocation3 + $0x7c] sm:$0xf]  ;;  %v1500_v29 = vld [vmem:[#allocation3 + $0xa8] sm:$0xf0]  ;;  %220 = vmatpush.bf16.msra.mxu0 %v1427_v17  ;;  %v1499_v30 = vor.u32 %v1938_v27, %v1498_v25  ;;  %v1490_v32 = vld [vmem:[#allocation3 + $0x70] sm:$0xf] }
  0x16   :  { %v1503_v31 = vor.u32 %v1932_v28, %v1500_v29  ;;  %v1937_v33 = vld [vmem:[#allocation3 + $0x9c] sm:$0xf0]  ;;  %v1450_v34 = vld [vmem:[#allocation3 + $0x18] sm:$0xf]  ;;  %234 = vmatpush.bf16.msra.mxu1 %v1431_v18  ;;  %v1926_v36 = vld [vmem:[#allocation3 + $0x44] sm:$0xf0] }
  0x17   :  { %248 = vmatpush.bf16.msra.mxu2 %v1435_v22  ;;  %v1491_v35 = vor.u32 %v1937_v33, %v1490_v32  ;;  %v1931_v37 = vld [vmem:[#allocation3 + $0x74] sm:$0xf]  ;;  %v1492_v38 = vld [vmem:[#allocation3 + $0xa0] sm:$0xf0]  ;;  %262 = vmatpush.bf16.msra.mxu3 %v1439_v26  ;;  %v1451_v39 = vor.u32 %v1926_v36, %v1450_v34  ;;  %v1920_v41 = vld [vmem:[#allocation3 + $0x1c] sm:$0xf] }
  0x18   :  { %v1495_v40 = vor.u32 %v1931_v37, %v1492_v38  ;;  %v1452_v42 = vld [vmem:[#allocation3 + $0x48] sm:$0xf0]  ;;  %v1442_v43 = vld [vmem:[#allocation3 + $0x10] sm:$0xf]  ;;  %1520 = vmatmul.msk.bf16.vlgmr.msra.gmra.mxu0 %vm209_vm0, %v2151_v24  ;;  %v1925_v45 = vld [vmem:[#allocation3 + $0x3c] sm:$0xf0] }
  0x19   :  { %v1455_v44 = vor.u32 %v1920_v41, %v1452_v42  ;;  %v1919_v46 = vld [vmem:[#allocation3 + $0x14] sm:$0xf]  ;;  %v1444_v47 = vld [vmem:[#allocation3 + $0x40] sm:$0xf0]  ;;  %1521 = vmatmul.msk.bf16.vlgmr.msra.gmra.mxu1 %vm209_vm0, %v2151_v24  ;;  %v1514_v48 = vld [vmem:[#allocation3 + $0x88] sm:$0xf]  ;;  %275 = vmatpush.bf16.msrb.mxu0 %v1491_v35  ;;  %v1443_v51 = vor.u32 %v1925_v45, %v1442_v43 }
  0x1a   :  { %1522 = vmatmul.msk.bf16.vlgmr.msra.gmra.mxu2 %vm209_vm0, %v2151_v24  ;;  %v1940_v49 = vld [vmem:[#allocation3 + $0xb4] sm:$0xf0]  ;;  %v1934_v50 = vld [vmem:[#allocation3 + $0x8c] sm:$0xf]  ;;  %1523 = vmatmul.msk.bf16.vlgmr.msra.gmra.mxu3 %vm209_vm0, %v2151_v24  ;;  %v1516_v53 = vld [vmem:[#allocation3 + $0xb8] sm:$0xf0]  ;;  %v1447_v56 = vor.u32 %v1919_v46, %v1444_v47 }
  0x1b   :  { %303 = vmatpush.bf16.msrb.mxu2 %v1499_v30  ;;  %317 = vmatpush.bf16.msrb.mxu3 %v1503_v31  ;;  %v1515_v52 = vor.u32 %v1940_v49, %v1514_v48  ;;  %v1506_v54 = vld [vmem:[#allocation3 + $0x80] sm:$0xf]  ;;  %v1939_v55 = vld [vmem:[#allocation3 + $0xac] sm:$0xf0]  ;;  %v1519_v57 = vor.u32 %v1934_v50, %v1516_v53  ;;  %v1466_v59 = vld [vmem:[#allocation3 + $0x28] sm:$0xf] }
  0x1c   :  { %289 = vmatpush.bf16.msrb.mxu1 %v1495_v40  ;;  %v1507_v58 = vor.u32 %v1939_v55, %v1506_v54  ;;  %v1928_v60 = vld [vmem:[#allocation3 + $0x54] sm:$0xf0]  ;;  %v1933_v61 = vld [vmem:[#allocation3 + $0x84] sm:$0xf]  ;;  %v1508_v63 = vld [vmem:[#allocation3 + $0xb0] sm:$0xf0] }
  0x1d   :  { %v1467_v62 = vor.u32 %v1928_v60, %v1466_v59  ;;  %v1922_v0 = vld [vmem:[#allocation3 + $0x2c] sm:$0xf]  ;;  %v1468_v1 = vld [vmem:[#allocation3 + $0x58] sm:$0xf0]  ;;  %v1511_v2 = vor.u32 %v1933_v61, %v1508_v63  ;;  %v1458_v4 = vld [vmem:[#allocation3 + $0x20] sm:$0xf]  ;;  %276 = vmatpush.bf16.msrb.mxu0 %v1443_v51 }
  0x1e   :  { %v1471_v3 = vor.u32 %v1922_v0, %v1468_v1  ;;  %v1927_v5 = vld [vmem:[#allocation3 + $0x4c] sm:$0xf0]  ;;  %v1921_v6 = vld [vmem:[#allocation3 + $0x24] sm:$0xf]  ;;  %v1460_v7 = vld [vmem:[#allocation3 + $0x50] sm:$0xf0] }
  0x1f   :  { %304 = vmatpush.bf16.msrb.mxu2 %v1451_v39  ;;  %318 = vmatpush.bf16.msrb.mxu3 %v1455_v44  ;;  %v1459_v8 = vor.u32 %v1927_v5, %v1458_v4  ;;  %v1463_v9 = vor.u32 %v1921_v6, %v1460_v7  ;;  %v1948_v10 = vld [vmem:[#allocation5 + $0x38] sm:$0xff]  ;;  %v1955_v15 = vld [vmem:[#allocation5 + $0x70] sm:$0xff]  ;;  %v1946_v18 = vld [vmem:[#allocation5 + $0x28] sm:$0xff] }
  0x20   :  { %290 = vmatpush.bf16.msrb.mxu1 %v1447_v56  ;;  %v1956_v11 = vld [vmem:[#allocation5 + $0x78] sm:$0xff]  ;;  %v1963_v16 = vld [vmem:[#allocation5 + $0xb0] sm:$0xff]  ;;  %v1954_v19 = vld [vmem:[#allocation5 + $0x68] sm:$0xff] }
  0x21   :  { %331 = vmatpush.bf16.msra.mxu0 %v1507_v58  ;;  %v1964_v12 = vld [vmem:[#allocation5 + $0xb8] sm:$0xff]  ;;  %v1971_v17 = vld [vmem:[#allocation5 + $0xf0] sm:$0xff]  ;;  %v1962_v20 = vld [vmem:[#allocation5 + $0xa8] sm:$0xff] }
  0x22   :  { %v1972_v13 = vld [vmem:[#allocation5 + $0xf8] sm:$0xff]  ;;  %v1970_v21 = vld [vmem:[#allocation5 + $0xe8] sm:$0xff]  ;;  %v1945_v22 = vld [vmem:[#allocation5 + $0x20] sm:$0xff] }
  0x23   :  { %359 = vmatpush.bf16.msra.mxu2 %v1515_v52  ;;  %373 = vmatpush.bf16.msra.mxu3 %v1519_v57  ;;  %v1953_v23 = vld [vmem:[#allocation5 + $0x60] sm:$0xff]  ;;  %v1944_v27 = vld [vmem:[#allocation5 + $0x18] sm:$0xff]  ;;  %v1943_v31 = vld [vmem:[#allocation5 + $0x10] sm:$0xff] }
  0x24   :  { %345 = vmatpush.bf16.msra.mxu1 %v1511_v2  ;;  %v1961_v25 = vld [vmem:[#allocation5 + $0xa0] sm:$0xff]  ;;  %v1952_v28 = vld [vmem:[#allocation5 + $0x58] sm:$0xff]  ;;  %v1951_v32 = vld [vmem:[#allocation5 + $0x50] sm:$0xff] }
  0x25   :  { %332 = vmatpush.bf16.msra.mxu0 %v1459_v8  ;;  %v1969_v26 = vld [vmem:[#allocation5 + $0xe0] sm:$0xff]  ;;  %v1960_v29 = vld [vmem:[#allocation5 + $0x98] sm:$0xff]  ;;  %v1959_v33 = vld [vmem:[#allocation5 + $0x90] sm:$0xff] }
  0x26   :  { %v1968_v30 = vld [vmem:[#allocation5 + $0xd8] sm:$0xff]  ;;  %v1967_v34 = vld [vmem:[#allocation5 + $0xd0] sm:$0xff]  ;;  %v1942_v35 = vld [vmem:[#allocation5 + $0x8] sm:$0xff] }
  0x27   :  { %360 = vmatpush.bf16.msra.mxu2 %v1467_v62  ;;  %374 = vmatpush.bf16.msra.mxu3 %v1471_v3  ;;  %v1950_v36 = vld [vmem:[#allocation5 + $0x48] sm:$0xff]  ;;  %v1941_v39 = vld [vmem:[#allocation5] sm:$0xff]  ;;  %v1980_v40 = vld [vmem:[#allocation5 + $0x138] sm:$0xff] }
  0x28   :  { %346 = vmatpush.bf16.msra.mxu1 %v1463_v9  ;;  %1524 = vmatmul.msk.bf16.vlgmr.msrb.gmra.mxu0 %vm209_vm0, %v2151_v24  ;;  %v1958_v37 = vld [vmem:[#allocation5 + $0x88] sm:$0xff]  ;;  %v1988_v41 = vld [vmem:[#allocation5 + $0x178] sm:$0xff]  ;;  %v1957_v42 = vld [vmem:[#allocation5 + $0x80] sm:$0xff] }
  0x29   :  { %1525 = vmatmul.msk.bf16.vlgmr.msrb.gmra.mxu1 %vm209_vm0, %v2151_v24  ;;  %1225 = vmatpush.bf16.msrb.mxu0 %v1948_v10  ;;  %v1966_v38 = vld [vmem:[#allocation5 + $0xc8] sm:$0xff]  ;;  %v1965_v43 = vld [vmem:[#allocation5 + $0xc0] sm:$0xff]  ;;  %v1996_v44 = vld [vmem:[#allocation5 + $0x1b8] sm:$0xff] }
  0x2a   :  { %1526 = vmatmul.msk.bf16.vlgmr.msrb.gmra.mxu2 %vm209_vm0, %v2151_v24  ;;  %1527 = vmatmul.msk.bf16.vlgmr.msrb.gmra.mxu3 %vm209_vm0, %v2151_v24  ;;  %v2004_v45 = vld [vmem:[#allocation5 + $0x1f8] sm:$0xff]  ;;  %v1979_v46 = vld [vmem:[#allocation5 + $0x130] sm:$0xff]  ;;  %v1978_v50 = vld [vmem:[#allocation5 + $0x128] sm:$0xff] }
  0x2b   :  { %1253 = vmatpush.bf16.msrb.mxu2 %v1964_v12  ;;  %1267 = vmatpush.bf16.msrb.mxu3 %v1972_v13  ;;  %v1987_v47 = vld [vmem:[#allocation5 + $0x170] sm:$0xff]  ;;  %v1986_v51 = vld [vmem:[#allocation5 + $0x168] sm:$0xff]  ;;  %v1977_v54 = vld [vmem:[#allocation5 + $0x120] sm:$0xff] }
  0x2c   :  { %1239 = vmatpush.bf16.msrb.mxu1 %v1956_v11  ;;  %v1995_v48 = vld [vmem:[#allocation5 + $0x1b0] sm:$0xff]  ;;  %v1994_v52 = vld [vmem:[#allocation5 + $0x1a8] sm:$0xff]  ;;  %v1985_v55 = vld [vmem:[#allocation5 + $0x160] sm:$0xff] }
  0x2d   :  { %1226 = vmatpush.bf16.msrb.mxu0 %v1947_v14  ;;  %v2003_v49 = vld [vmem:[#allocation5 + $0x1f0] sm:$0xff]  ;;  %v2002_v53 = vld [vmem:[#allocation5 + $0x1e8] sm:$0xff]  ;;  %v1976_v56 = vld [vmem:[#allocation5 + $0x118] sm:$0xff] }
  0x2e   :  { %v1984_v57 = vld [vmem:[#allocation5 + $0x158] sm:$0xff]  ;;  %v1993_v58 = vld [vmem:[#allocation5 + $0x1a0] sm:$0xff]  ;;  %v1975_v60 = vld [vmem:[#allocation5 + $0x110] sm:$0xff] }
  0x2f   :  { %1254 = vmatpush.bf16.msrb.mxu2 %v1963_v16  ;;  %1268 = vmatpush.bf16.msrb.mxu3 %v1971_v17  ;;  %v2001_v59 = vld [vmem:[#allocation5 + $0x1e0] sm:$0xff]  ;;  %v1983_v61 = vld [vmem:[#allocation5 + $0x150] sm:$0xff]  ;;  %v1992_v62 = vld [vmem:[#allocation5 + $0x198] sm:$0xff] }
  0x30   :  { %1240 = vmatpush.bf16.msrb.mxu1 %v1955_v15  ;;  %v2000_v63 = vld [vmem:[#allocation5 + $0x1d8] sm:$0xff]  ;;  %v1974_v0 = vld [vmem:[#allocation5 + $0x108] sm:$0xff]  ;;  %v1991_v2 = vld [vmem:[#allocation5 + $0x190] sm:$0xff] }
  0x31   :  { %1227 = vmatpush.bf16.msrb.mxu0 %v1946_v18  ;;  %v1982_v1 = vld [vmem:[#allocation5 + $0x148] sm:$0xff]  ;;  %v1999_v3 = vld [vmem:[#allocation5 + $0x1d0] sm:$0xff]  ;;  %v1973_v4 = vld [vmem:[#allocation5 + $0x100] sm:$0xff] }
  0x32   :  { %v1981_v5 = vld [vmem:[#allocation5 + $0x140] sm:$0xff]  ;;  %v1990_v6 = vld [vmem:[#allocation5 + $0x188] sm:$0xff] }
  0x33   :  { %1255 = vmatpush.bf16.msrb.mxu2 %v1962_v20  ;;  %1269 = vmatpush.bf16.msrb.mxu3 %v1970_v21  ;;  %v1998_v7 = vld [vmem:[#allocation5 + $0x1c8] sm:$0xff]  ;;  %v1989_v8 = vld [vmem:[#allocation5 + $0x180] sm:$0xff]  ;;  %v2012_v20 = vld [vmem:[#allocation5 + $0x238] sm:$0xff] }
  0x34   :  { %1241 = vmatpush.bf16.msrb.mxu1 %v1954_v19  ;;  %v1997_v9 = vld [vmem:[#allocation5 + $0x1c0] sm:$0xff] }
  0x35   :  { %1228 = vmatpush.bf16.msrb.mxu0 %v1945_v22  ;;  %v2020_v22 = vld [vmem:[#allocation5 + $0x278] sm:$0xff] }
  0x37   :  { %1256 = vmatpush.bf16.msrb.mxu2 %v1961_v25  ;;  %1270 = vmatpush.bf16.msrb.mxu3 %v1969_v26  ;;  %v2011_v25 = vld [vmem:[#allocation5 + $0x230] sm:$0xff] }
  0x38   :  { %1242 = vmatpush.bf16.msrb.mxu1 %v1953_v23  ;;  %1528 = vmatmul.msk.bf16.vlgmr.msra.gmra.mxu0 %vm209_vm0, %v2151_v24 }
  0x39   :  { %1529 = vmatmul.msk.bf16.vlgmr.msra.gmra.mxu1 %vm209_vm0, %v2151_v24  ;;  %1229 = vmatpush.bf16.msrb.mxu0 %v1944_v27  ;;  %v2019_v27 = vld [vmem:[#allocation5 + $0x270] sm:$0xff] }
  0x3a   :  { %1530 = vmatmul.msk.bf16.vlgmr.msra.gmra.mxu2 %vm209_vm0, %v2151_v24  ;;  %1531 = vmatmul.msk.bf16.vlgmr.msra.gmra.mxu3 %vm209_vm0, %v2151_v24  ;;  %v1949_v24 = vld [vmem:[#allocation5 + $0x40] sm:$0xff] }
  0x3b   :  { %1257 = vmatpush.bf16.msrb.mxu2 %v1960_v29  ;;  %1271 = vmatpush.bf16.msrb.mxu3 %v1968_v30 }
  0x3c   :  { %1243 = vmatpush.bf16.msrb.mxu1 %v1952_v28 }
  0x3d   :  { %1230 = vmatpush.bf16.msrb.mxu0 %v1943_v31 }
  0x3f   :  { %1258 = vmatpush.bf16.msrb.mxu2 %v1959_v33  ;;  %1272 = vmatpush.bf16.msrb.mxu3 %v1967_v34 }
  0x40   :  { %1244 = vmatpush.bf16.msrb.mxu1 %v1951_v32 }
  0x41   :  { %1231 = vmatpush.bf16.msrb.mxu0 %v1942_v35  ;;  %v2028_v35 = vld [vmem:[#allocation5 + $0x2b8] sm:$0xff] }
  0x43   :  { %1259 = vmatpush.bf16.msrb.mxu2 %v1958_v37  ;;  %1273 = vmatpush.bf16.msrb.mxu3 %v1966_v38  ;;  %v2036_v37 = vld [vmem:[#allocation5 + $0x2f8] sm:$0xff]  ;;  %v2010_v38 = vld [vmem:[#allocation5 + $0x228] sm:$0xff] }
  0x44   :  { %1245 = vmatpush.bf16.msrb.mxu1 %v1950_v36 }
  0x45   :  { %1232 = vmatpush.bf16.msrb.mxu0 %v1941_v39 }
  0x47   :  { %1260 = vmatpush.bf16.msrb.mxu2 %v1957_v42  ;;  %1274 = vmatpush.bf16.msrb.mxu3 %v1965_v43  ;;  %v2009_v42 = vld [vmem:[#allocation5 + $0x220] sm:$0xff] }
  0x48   :  { %1246 = vmatpush.bf16.msrb.mxu1 %v1949_v24  ;;  %v2018_v24 = vld [vmem:[#allocation5 + $0x268] sm:$0xff] }
  0x49   :  { %1281 = vmatpush.bf16.msra.mxu0 %v1980_v40  ;;  %v2027_v40 = vld [vmem:[#allocation5 + $0x2b0] sm:$0xff] }
  0x4b   :  { %1309 = vmatpush.bf16.msra.mxu2 %v1996_v44  ;;  %1323 = vmatpush.bf16.msra.mxu3 %v2004_v45  ;;  %v2017_v45 = vld [vmem:[#allocation5 + $0x260] sm:$0xff] }
  0x4c   :  { %1295 = vmatpush.bf16.msra.mxu1 %v1988_v41  ;;  %v2035_v41 = vld [vmem:[#allocation5 + $0x2f0] sm:$0xff] }
  0x4d   :  { %1282 = vmatpush.bf16.msra.mxu0 %v1979_v46 }
  0x4f   :  { %1310 = vmatpush.bf16.msra.mxu2 %v1995_v48  ;;  %1324 = vmatpush.bf16.msra.mxu3 %v2003_v49 }
  0x50   :  { %1296 = vmatpush.bf16.msra.mxu1 %v1987_v47 }
  0x51   :  { %1283 = vmatpush.bf16.msra.mxu0 %v1978_v50 }
  0x53   :  { %1311 = vmatpush.bf16.msra.mxu2 %v1994_v52  ;;  %1325 = vmatpush.bf16.msra.mxu3 %v2002_v53  ;;  %v2034_v53 = vld [vmem:[#allocation5 + $0x2e8] sm:$0xff] }
  0x54   :  { %1297 = vmatpush.bf16.msra.mxu1 %v1986_v51  ;;  %v2026_v51 = vld [vmem:[#allocation5 + $0x2a8] sm:$0xff] }
  0x55   :  { %1284 = vmatpush.bf16.msra.mxu0 %v1977_v54 }
  0x57   :  { %1312 = vmatpush.bf16.msra.mxu2 %v1993_v58  ;;  %1326 = vmatpush.bf16.msra.mxu3 %v2001_v59  ;;  %v2025_v58 = vld [vmem:[#allocation5 + $0x2a0] sm:$0xff] }
  0x58   :  { %1298 = vmatpush.bf16.msra.mxu1 %v1985_v55  ;;  %v2008_v55 = vld [vmem:[#allocation5 + $0x218] sm:$0xff]  ;;  %v2033_v59 = vld [vmem:[#allocation5 + $0x2e0] sm:$0xff] }
  0x59   :  { %1285 = vmatpush.bf16.msra.mxu0 %v1976_v56  ;;  %v2016_v56 = vld [vmem:[#allocation5 + $0x258] sm:$0xff] }
  0x5b   :  { %1313 = vmatpush.bf16.msra.mxu2 %v1992_v62  ;;  %1327 = vmatpush.bf16.msra.mxu3 %v2000_v63  ;;  %v2015_v62 = vld [vmem:[#allocation5 + $0x250] sm:$0xff] }
  0x5c   :  { %1299 = vmatpush.bf16.msra.mxu1 %v1984_v57 }
  0x5d   :  { %1286 = vmatpush.bf16.msra.mxu0 %v1975_v60 }
  0x5f   :  { %1314 = vmatpush.bf16.msra.mxu2 %v1991_v2  ;;  %1328 = vmatpush.bf16.msra.mxu3 %v1999_v3 }
  0x60   :  { %1300 = vmatpush.bf16.msra.mxu1 %v1983_v61  ;;  %v2007_v61 = vld [vmem:[#allocation5 + $0x210] sm:$0xff] }
  0x61   :  { %1287 = vmatpush.bf16.msra.mxu0 %v1974_v0 }
  0x63   :  { %1315 = vmatpush.bf16.msra.mxu2 %v1990_v6  ;;  %1329 = vmatpush.bf16.msra.mxu3 %v1998_v7  ;;  %v2024_v6 = vld [vmem:[#allocation5 + $0x298] sm:$0xff] }
  0x64   :  { %1301 = vmatpush.bf16.msra.mxu1 %v1982_v1 }
  0x65   :  { %1288 = vmatpush.bf16.msra.mxu0 %v1973_v4 }
  0x67   :  { %1316 = vmatpush.bf16.msra.mxu2 %v1989_v8  ;;  %1330 = vmatpush.bf16.msra.mxu3 %v1997_v9  ;;  %v2032_v8 = vld [vmem:[#allocation5 + $0x2d8] sm:$0xff] }
  0x68   :  { %1302 = vmatpush.bf16.msra.mxu1 %v1981_v5 }
  0x95   :  { %v222_v10 = vpop.f32.mrf.mxu0 }
  0x96   :  { %v236_v11 = vpop.f32.mrf.mxu1  ;;  %v417_v12 = vmax.f32 %v222_v10, 0.0  ;;  %v2006_v10 = vld [vmem:[#allocation5 + $0x208] sm:$0xff] }
  0x97   :  { %v418_v14 = vmax.f32 %v236_v11, 0.0  ;;  %v2014_v11 = vld [vmem:[#allocation5 + $0x248] sm:$0xff] }
  0x9d   :  { %v250_v13 = vpop.f32.mrf.mxu2  ;;  %v264_v15 = vpop.f32.mrf.mxu3 }
  0x9e   :  { %v224_v16 = vpop.f32.mrf.mxu0  ;;  %v238_v18 = vpop.f32.mrf.mxu1  ;;  %v419_v28 = vmax.f32 %v250_v13, 0.0  ;;  %v420_v32 = vmax.f32 %v264_v15, 0.0  ;;  %v2031_v13 = vld [vmem:[#allocation5 + $0x2d0] sm:$0xff] }
  0x9f   :  { %v429_v17 = vmax.f32 %v224_v16, 0.0  ;;  %v430_v19 = vmax.f32 %v238_v18, 0.0  ;;  %v2005_v16 = vld [vmem:[#allocation5 + $0x200] sm:$0xff] }
  0xa1   :  { %v441_v21 = vpack.c.bf16 %v429_v17, %v417_v12  ;;  %v442_v23 = vpack.c.bf16 %v430_v19, %v418_v14  ;;  %v2023_v12 = vld [vmem:[#allocation5 + $0x290] sm:$0xff]  ;;  %v2013_v17 = vld [vmem:[#allocation5 + $0x240] sm:$0xff] }
  0xa3   :  { %1233 = vmatmul.bf16.vlgmr.msrb.gmra.mxu0 %v441_v21  ;;  %1247 = vmatmul.bf16.vlgmr.msrb.gmra.mxu1 %v442_v23  ;;  %v2022_v23 = vld [vmem:[#allocation5 + $0x288] sm:$0xff] }
  0xa4   :  { %1337 = vmatpush.bf16.msrb.mxu0 %v2012_v20  ;;  %1351 = vmatpush.bf16.msrb.mxu1 %v2020_v22 }
  0xa5   :  { %v252_v26 = vpop.f32.mrf.mxu2  ;;  %v266_v30 = vpop.f32.mrf.mxu3 }
  0xa6   :  { %v431_v29 = vmax.f32 %v252_v26, 0.0  ;;  %v278_v31 = vpop.f32.mrf.mxu0  ;;  %v432_v33 = vmax.f32 %v266_v30, 0.0  ;;  %v292_v34 = vpop.f32.mrf.mxu1  ;;  %v2030_v26 = vld [vmem:[#allocation5 + $0x2c8] sm:$0xff]  ;;  %v2029_v30 = vld [vmem:[#allocation5 + $0x2c0] sm:$0xff] }
  0xa7   :  { %v421_v43 = vmax.f32 %v278_v31, 0.0  ;;  %v422_v46 = vmax.f32 %v292_v34, 0.0 }
  0xa8   :  { %v443_v36 = vpack.c.bf16 %v431_v29, %v419_v28  ;;  %1338 = vmatpush.bf16.msrb.mxu0 %v2011_v25  ;;  %v444_v39 = vpack.c.bf16 %v432_v33, %v420_v32  ;;  %1352 = vmatpush.bf16.msrb.mxu1 %v2019_v27  ;;  %v2021_v29 = vld [vmem:[#allocation5 + $0x280] sm:$0xff] }
  0xaa   :  { %1261 = vmatmul.bf16.vlgmr.msrb.gmra.mxu2 %v443_v36  ;;  %1275 = vmatmul.bf16.vlgmr.msrb.gmra.mxu3 %v444_v39 }
  0xab   :  { %1365 = vmatpush.bf16.msrb.mxu2 %v2028_v35  ;;  %1379 = vmatpush.bf16.msrb.mxu3 %v2036_v37 }
  0xac   :  { %1339 = vmatpush.bf16.msrb.mxu0 %v2010_v38  ;;  %1353 = vmatpush.bf16.msrb.mxu1 %v2018_v24 }
  0xad   :  { %v306_v44 = vpop.f32.mrf.mxu2  ;;  %v320_v47 = vpop.f32.mrf.mxu3 }
  0xae   :  { %v280_v48 = vpop.f32.mrf.mxu0  ;;  %v294_v50 = vpop.f32.mrf.mxu1  ;;  %v423_v63 = vmax.f32 %v306_v44, 0.0  ;;  %v424_v3 = vmax.f32 %v320_v47, 0.0 }
  0xaf   :  { %v433_v49 = vmax.f32 %v280_v48, 0.0  ;;  %1366 = vmatpush.bf16.msrb.mxu2 %v2027_v40  ;;  %v434_v52 = vmax.f32 %v294_v50, 0.0  ;;  %1380 = vmatpush.bf16.msrb.mxu3 %v2035_v41  ;;  %v2043_v40 = vld [vmem:[%s2192_s3] ss:$0 sm:$0xff] }
  0xb0   :  { %1340 = vmatpush.bf16.msrb.mxu0 %v2009_v42  ;;  %1354 = vmatpush.bf16.msrb.mxu1 %v2017_v45 }
  0xb1   :  { %v445_v54 = vpack.c.bf16 %v433_v49, %v421_v43  ;;  %v446_v57 = vpack.c.bf16 %v434_v52, %v422_v46 }
  0xb3   :  { %1367 = vmatpush.bf16.msrb.mxu2 %v2026_v51  ;;  %1289 = vmatmul.bf16.vlgmr.msra.gmra.mxu0 %v445_v54 }
  0xb4   :  { %1381 = vmatpush.bf16.msrb.mxu3 %v2034_v53  ;;  %1303 = vmatmul.bf16.vlgmr.msra.gmra.mxu1 %v446_v57 }
  0xb5   :  { %v308_v60 = vpop.f32.mrf.mxu2  ;;  %1341 = vmatpush.bf16.msrb.mxu0 %v2008_v55  ;;  %1355 = vmatpush.bf16.msrb.mxu1 %v2016_v56  ;;  %v322_v1 = vpop.f32.mrf.mxu3 }
  0xb6   :  { %v435_v0 = vmax.f32 %v308_v60, 0.0  ;;  %v334_v2 = vpop.f32.mrf.mxu0  ;;  %v436_v4 = vmax.f32 %v322_v1, 0.0  ;;  %v348_v5 = vpop.f32.mrf.mxu1 }
  0xb7   :  { %1368 = vmatpush.bf16.msrb.mxu2 %v2025_v58  ;;  %v425_v14 = vmax.f32 %v334_v2, 0.0  ;;  %v426_v18 = vmax.f32 %v348_v5, 0.0 }
  0xb8   :  { %v447_v7 = vpack.c.bf16 %v435_v0, %v423_v63  ;;  %1382 = vmatpush.bf16.msrb.mxu3 %v2033_v59  ;;  %v448_v9 = vpack.c.bf16 %v436_v4, %v424_v3 }
  0xb9   :  { %1342 = vmatpush.bf16.msrb.mxu0 %v2007_v61  ;;  %1356 = vmatpush.bf16.msrb.mxu1 %v2015_v62 }
  0xba   :  { %1317 = vmatmul.bf16.vlgmr.msra.gmra.mxu2 %v447_v7  ;;  %1331 = vmatmul.bf16.vlgmr.msra.gmra.mxu3 %v448_v9 }
  0xbb   :  { %1369 = vmatpush.bf16.msrb.mxu2 %v2024_v6 }
  0xbc   :  { %1383 = vmatpush.bf16.msrb.mxu3 %v2032_v8 }
  0xbd   :  { %v362_v15 = vpop.f32.mrf.mxu2  ;;  %1343 = vmatpush.bf16.msrb.mxu0 %v2006_v10  ;;  %1357 = vmatpush.bf16.msrb.mxu1 %v2014_v11  ;;  %v376_v19 = vpop.f32.mrf.mxu3 }
  0xbe   :  { %v336_v20 = vpop.f32.mrf.mxu0  ;;  %v350_v22 = vpop.f32.mrf.mxu1  ;;  %v427_v32 = vmax.f32 %v362_v15, 0.0  ;;  %v428_v35 = vmax.f32 %v376_v19, 0.0 }
  0xbf   :  { %v437_v21 = vmax.f32 %v336_v20, 0.0  ;;  %1370 = vmatpush.bf16.msrb.mxu2 %v2023_v12  ;;  %v438_v25 = vmax.f32 %v350_v22, 0.0 }
  0xc0   :  { %1384 = vmatpush.bf16.msrb.mxu3 %v2031_v13 }
  0xc1   :  { %v449_v27 = vpack.c.bf16 %v437_v21, %v425_v14  ;;  %1344 = vmatpush.bf16.msrb.mxu0 %v2005_v16  ;;  %1358 = vmatpush.bf16.msrb.mxu1 %v2013_v17  ;;  %v450_v28 = vpack.c.bf16 %v438_v25, %v426_v18  ;;  %v2044_v17 = vld [vmem:[%s2193_s4] ss:$0 sm:$0xff] }
  0xc3   :  { %1371 = vmatpush.bf16.msrb.mxu2 %v2022_v23 }
  0xc4   :  { %1385 = vmatpush.bf16.msrb.mxu3 %v2030_v26  ;;  %1345 = vmatmul.bf16.vlgmr.msrb.gmra.mxu0 %v449_v27 }
  0xc5   :  { %1359 = vmatmul.bf16.vlgmr.msrb.gmra.mxu1 %v450_v28  ;;  %v364_v31 = vpop.f32.mrf.mxu2  ;;  %v378_v34 = vpop.f32.mrf.mxu3 }
  0xc6   :  { %v439_v33 = vmax.f32 %v364_v31, 0.0  ;;  %v440_v36 = vmax.f32 %v378_v34, 0.0 }
  0xc7   :  { %1372 = vmatpush.bf16.msrb.mxu2 %v2021_v29  ;;  %v2045_v29 = vld [vmem:[#allocation2] ss:$0 sm:$0xff] }
  0xc8   :  { %v451_v37 = vpack.c.bf16 %v439_v33, %v427_v32  ;;  %1386 = vmatpush.bf16.msrb.mxu3 %v2029_v30  ;;  %v452_v38 = vpack.c.bf16 %v440_v36, %v428_v35 }
  0xca   :  { %1373 = vmatmul.bf16.vlgmr.msrb.gmra.mxu2 %v451_v37 }
  0xcb   :  { %1387 = vmatmul.bf16.vlgmr.msrb.gmra.mxu3 %v452_v38 }
 0x120   :  { %v1234_v39 = vpop.f32.mrf.mxu0  ;;  %v1248_v24 = vpop.f32.mrf.mxu1 }
 0x121   :  { %v1235_v43 = vadd.f32 %v2043_v40, %v1234_v39 }
 0x123   :  { %v1249_v46 = vadd.f32 %v1248_v24, %v1235_v43 }
 0x128   :  { %v1236_v41 = vpop.f32.mrf.mxu0  ;;  %v1250_v42 = vpop.f32.mrf.mxu1 }
 0x129   :  { %v1237_v49 = vadd.f32 %v2043_v40, %v1236_v41 }
 0x12b   :  { %v1251_v54 = vadd.f32 %v1250_v42, %v1237_v49 }
 0x12d   :  { %v1262_v44 = vpop.f32.mrf.mxu2  ;;  %v1276_v45 = vpop.f32.mrf.mxu3 }
 0x12e   :  { %v1263_v48 = vadd.f32 %v1262_v44, %v1249_v46 }
 0x130   :  { %v1290_v47 = vpop.f32.mrf.mxu0  ;;  %v1277_v52 = vadd.f32 %v1276_v45, %v1263_v48 }
 0x131   :  { %v1304_v50 = vpop.f32.mrf.mxu1 }
 0x132   :  { %v1291_v56 = vadd.f32 %v1290_v47, %v1277_v52 }
 0x134   :  { %v1305_v59 = vadd.f32 %v1304_v50, %v1291_v56 }
 0x135   :  { %v1264_v51 = vpop.f32.mrf.mxu2  ;;  %v1278_v53 = vpop.f32.mrf.mxu3 }
 0x136   :  { %v1265_v57 = vadd.f32 %v1264_v51, %v1251_v54 }
 0x138   :  { %v1292_v55 = vpop.f32.mrf.mxu0  ;;  %v1279_v60 = vadd.f32 %v1278_v53, %v1265_v57 }
 0x139   :  { %v1306_v62 = vpop.f32.mrf.mxu1 }
 0x13a   :  { %v1293_v0 = vadd.f32 %v1292_v55, %v1279_v60 }
 0x13c   :  { %v1307_v4 = vadd.f32 %v1306_v62, %v1293_v0 }
 0x13d   :  { %v1318_v58 = vpop.f32.mrf.mxu2  ;;  %v1332_v61 = vpop.f32.mrf.mxu3 }
 0x13e   :  { %v1319_v63 = vadd.f32 %v1318_v58, %v1305_v59 }
 0x140   :  { %v1333_v2 = vadd.f32 %v1332_v61, %v1319_v63 }
 0x141   :  { %v1346_v1 = vpop.f32.mrf.mxu0 }
 0x142   :  { %v1347_v6 = vadd.f32 %v1346_v1, %v1333_v2  ;;  %v1360_v8 = vpop.f32.mrf.mxu1 }
 0x144   :  { %v1361_v9 = vadd.f32 %v1360_v8, %v1347_v6 }
 0x145   :  { %v1320_v3 = vpop.f32.mrf.mxu2  ;;  %v1334_v5 = vpop.f32.mrf.mxu3 }
 0x146   :  { %v1321_v7 = vadd.f32 %v1320_v3, %v1307_v4 }
 0x148   :  { %v1335_v10 = vadd.f32 %v1334_v5, %v1321_v7 }
 0x149   :  { %v1348_v11 = vpop.f32.mrf.mxu0 }
 0x14a   :  { %v1349_v15 = vadd.f32 %v1348_v11, %v1335_v10  ;;  %v1362_v19 = vpop.f32.mrf.mxu1 }
 0x14c   :  { %v1363_v20 = vadd.f32 %v1362_v19, %v1349_v15 }
 0x14d   :  { %v1374_v12 = vpop.f32.mrf.mxu2 }
 0x14e   :  { %v1375_v13 = vadd.f32 %v1374_v12, %v1361_v9  ;;  %v1388_v14 = vpop.f32.mrf.mxu3 }
 0x150   :  { %v1389_v16 = vadd.f32 %v1388_v14, %v1375_v13 }
 0x152   :  { %v1393_v18 = vmax.f32 %v1389_v16, 0.0 }
 0x154   :  { %v1399_v21 = vmul.f32 %v2044_v17, %v1393_v18 }
 0x155   :  { %v1376_v22 = vpop.f32.mrf.mxu2 }
 0x156   :  { %v1377_v23 = vadd.f32 %v1376_v22, %v1363_v20  ;;  %1401 = vadd.xlane.f32.xlu0 %v1399_v21  ;;  %v1390_v25 = vpop.f32.mrf.mxu3 }
 0x158   :  { %v1391_v26 = vadd.f32 %v1390_v25, %v1377_v23 }
 0x15a   :  { %v1394_v27 = vmax.f32 %v1391_v26, 0.0 }
 0x15c   :  { %v1400_v28 = vmul.f32 %v2044_v17, %v1394_v27 }
 0x15e   :  { %1403 = vadd.xlane.f32.xlu0 %v1400_v28 }
 0x1c9   :  { %v1402_v30 = vpop.xlane.xlu0 %1401 }
 0x1ca   :  { %v1409_v31 = vadd.f32 %v2045_v29, %v1402_v30 }
 0x1cc   :  { %1412 = vst.msk [vmem:[%s2195_s6] sm:$0xff] %vm1411_vm1, %v1409_v31 }
 0x1d1   :  { %v1404_v32 = vpop.xlane.xlu0 %1403 }
 0x1d2   :  { %v1410_v33 = vadd.f32 %v2045_v29, %v1404_v32 }
 0x1d4   :  { %1413 = vst.msk [vmem:[%s2195_s6 + $0x8] sm:$0xff] %vm1411_vm1, %v1410_v33 }
 0x1d5   :  { %1418 = vsyncpa [#allocation4], 1 }
 0x1d6   :  { %1419 = vsyncpa [#allocation6], 1 }

</bundles_post_ra>
